<compile_context>
chip_gen: v7x
topology: tpu7x:2x2x1
jax: 0.10.0
libtpu: 0.0.40
codegen_flags: <defaults>
</compile_context>

<pallas_src>
import functools

import jax
import jax.numpy as jnp
import numpy as np
from jax import lax
from jax.experimental import pallas as pl
from jax.experimental.pallas import tpu as pltpu

_LANES = 128
_MAX_TILE_ROWS = 2048    # 2048 x 128 f32 = 1 MiB per tile (>= ~85% of HBM roofline)
_CHUNK_ROWS = 256        # 256 x 128 f32 = 128 KiB in-register working set per loop step
_MIN_TILES = 8           # keep the "parallel" grid axis splittable on v7x megacore
_FAST_MAX_ELEMS = 16384  # both inputs <= this -> single fused kernel (no pad, no mask)


def _cdiv(a, b):
    return -(-a // b)


def _ceil_to(x, m):
    return ((x + m - 1) // m) * m


def _softplus(v):
    # Stable softplus: max(v, 0) + log1p(exp(-|v|)).
    # exp/log1p ride the EUP slot; max/abs/add stay on the VALU.
    return jnp.maximum(v, 0.0) + jnp.log1p(jnp.exp(-jnp.abs(v)))


# ----------------------------- kernels --------------------------------------

def _fused_small_kernel(pos_ref, neg_ref, out_ref, *, inv_n_pos, inv_n_neg):
    """Fast path: whole (1, n) inputs in one launch, emits the final loss."""
    pos = pos_ref[...].astype(jnp.float32)
    neg = neg_ref[...].astype(jnp.float32)
    # label 1 -> softplus(-x); label 0 -> softplus(x).
    sp_pos = _softplus(-pos)
    sp_neg = _softplus(neg)
    out_ref[0, 0] = (jnp.sum(sp_pos) * jnp.float32(inv_n_pos)
                     + jnp.sum(sp_neg) * jnp.float32(inv_n_neg))


def _partial_sum_kernel(x_ref, out_ref, *, n_valid, negate, chunk_rows, need_mask):
    """Per-tile partial sum of softplus(+/-x) over a (tile_rows, 128) tile."""
    tile_rows = x_ref.shape[0]
    nchunks = tile_rows // chunk_rows

    def chunk_softplus(c):
        r0 = pl.multiple_of(c * chunk_rows, 8)
        v = x_ref[pl.ds(r0, chunk_rows), :].astype(jnp.float32)
        if negate:
            v = -v
        return _softplus(v)

    def unmasked_sum():
        def body(c, acc):
            return acc + jnp.sum(chunk_softplus(c), axis=0, keepdims=True)
        acc = lax.fori_loop(0, nchunks, body, jnp.zeros((1, _LANES), jnp.float32))
        return jnp.sum(acc)

    if not need_mask:
        out_ref[0, 0] = unmasked_sum()
        return

    i = pl.program_id(0)
    last = pl.num_programs(0) - 1

    @pl.when(i != last)
    def _():
        # Interior tiles never pay for the mask.
        out_ref[0, 0] = unmasked_sum()

    @pl.when(i == last)
    def _():
        # Only the boundary tile masks out padded elements / garbage rows
        # brought in by the partial boundary DMA.
        lane_idx = (lax.broadcasted_iota(jnp.int32, (chunk_rows, _LANES), 0) * _LANES
                    + lax.broadcasted_iota(jnp.int32, (chunk_rows, _LANES), 1))
        tile_base = i * (tile_rows * _LANES)

        def body(c, acc):
            sp = chunk_softplus(c)
            idx = tile_base + c * (chunk_rows * _LANES) + lane_idx
            sp = jnp.where(idx < n_valid, sp, 0.0)
            return acc + jnp.sum(sp, axis=0, keepdims=True)

        acc = lax.fori_loop(0, nchunks, body, jnp.zeros((1, _LANES), jnp.float32))
        out_ref[0, 0] = jnp.sum(acc)


# ----------------------------- wrappers --------------------------------------

def _prep(x):
    x = jnp.asarray(x)
    if x.dtype not in (jnp.dtype(jnp.float32), jnp.dtype(jnp.bfloat16)):
        x = x.astype(jnp.float32)
    return x.reshape(-1)  # free (bitcast) reshape


def _fused_small_loss(pos, neg, n_pos, n_neg):
    kernel = functools.partial(_fused_small_kernel,
                               inv_n_pos=1.0 / n_pos, inv_n_neg=1.0 / n_neg)
    out = pl.pallas_call(
        kernel,
        out_shape=jax.ShapeDtypeStruct((1, 1), jnp.float32),
        grid_spec=pltpu.PrefetchScalarGridSpec(
            num_scalar_prefetch=0,
            grid=(1,),
            in_specs=[pl.BlockSpec((1, n_pos), lambda i: (0, 0)),
                      pl.BlockSpec((1, n_neg), lambda i: (0, 0))],
            out_specs=pl.BlockSpec((1, 1), lambda i: (0, 0),
                                   memory_space=pltpu.SMEM),
        ),
        compiler_params=pltpu.CompilerParams(
            dimension_semantics=("arbitrary",)),
    )(pos.reshape(1, n_pos), neg.reshape(1, n_neg))
    return out[0, 0]


def _mean_softplus_tiled(flat, n, *, negate):
    """mean(softplus(+/-flat)) via per-tile partial sums reduced in JAX."""
    rows = _cdiv(n, _LANES)
    padded = rows * _LANES
    assert padded < 2 ** 31, "int32 flat-index mask would overflow"
    if padded != n:
        # Residual copy: only large inputs whose flat length is not a multiple
        # of 128 hit this (pad is <=127 elements, but XLA rewrites the buffer
        # once).  Every other path is pad-free.
        flat = jnp.pad(flat, (0, padded - n))
    x2d = flat.reshape(rows, _LANES)  # free (bitcast) reshape

    # Tile sizing: aim for >= _MIN_TILES tiles (megacore), cap at 1 MiB,
    # keep tile_rows a multiple of 16 (bf16-safe) and of chunk_rows.
    tile_rows = min(_MAX_TILE_ROWS, _ceil_to(_cdiv(rows, _MIN_TILES), 16))
    if tile_rows > _CHUNK_ROWS:
        tile_rows = min(_MAX_TILE_ROWS, _ceil_to(tile_rows, _CHUNK_ROWS))
    chunk_rows = min(_CHUNK_ROWS, tile_rows)
    num_tiles = _cdiv(rows, tile_rows)
    need_mask = (num_tiles * tile_rows * _LANES) != n

    kernel = functools.partial(
        _partial_sum_kernel, n_valid=n, negate=negate,
        chunk_rows=chunk_rows, need_mask=need_mask)

    partials = pl.pallas_call(
        kernel,
        out_shape=jax.ShapeDtypeStruct((num_tiles, 1), jnp.float32),
        grid_spec=pltpu.PrefetchScalarGridSpec(
            num_scalar_prefetch=0,
            grid=(num_tiles,),
            in_specs=[pl.BlockSpec((tile_rows, _LANES), lambda i: (i, 0))],
            out_specs=pl.BlockSpec((1, 1), lambda i: (i, 0),
                                   memory_space=pltpu.SMEM),
        ),
        compiler_params=pltpu.CompilerParams(
            dimension_semantics=("parallel",)),
    )(x2d)
    return jnp.sum(partials[:, 0]) / jnp.float32(n)


def bce_loss(pos_logits, neg_logits):
    """Pallas implementation of BCELoss.forward."""
    pos = _prep(pos_logits)
    neg = _prep(neg_logits)
    n_pos = int(pos.shape[0])
    n_neg = int(neg.shape[0])

    if n_pos == 0 or n_neg == 0:
        # Matches torch BCEWithLogitsLoss mean reduction over an empty tensor.
        return jnp.float32(jnp.nan)

    if n_pos <= _FAST_MAX_ELEMS and n_neg <= _FAST_MAX_ELEMS:
        return _fused_small_loss(pos, neg, n_pos, n_neg)

    return (_mean_softplus_tiled(pos, n_pos, negate=True)
            + _mean_softplus_tiled(neg, n_neg, negate=False))


# ---------------- pure-JAX reference (mirrors the PyTorch module) ------------
def _bce_ref(pos_logits, neg_logits):
    pos = jnp.asarray(pos_logits, jnp.float32)
    neg = jnp.asarray(neg_logits, jnp.float32)
    return jnp.mean(jax.nn.softplus(-pos)) + jnp.mean(jax.nn.softplus(neg))


if __name__ == "__main__":
    key = jax.random.PRNGKey(0)
    ks = jax.random.split(key, 10)

    def check(pos, neg):
        out = bce_loss(pos, neg)
        jax.block_until_ready(out)
        ref = _bce_ref(pos, neg)
        np.testing.assert_allclose(np.asarray(out), np.asarray(ref),
                                   rtol=1e-5, atol=1e-6)

    # 1) Typical small usage (fast fused single-launch path).
    check(jax.random.normal(ks[0], (8, 32), dtype=jnp.float32),
          jax.random.normal(ks[1], (8, 32), dtype=jnp.float32))

    # 2) Mismatched small shapes (still fast path, no padding anywhere).
    check(jax.random.normal(ks[2], (4, 48), dtype=jnp.float32) * 3.0,
          jax.random.normal(ks[3], (6, 80), dtype=jnp.float32) * 3.0)

    # 3) Larger 128-aligned inputs: tiled path, zero-copy reshape, per-input
    #    grids; the second input exercises the masked boundary tile.
    check(jax.random.normal(ks[4], (96, 512), dtype=jnp.float32),
          jax.random.normal(ks[5], (80, 384), dtype=jnp.float32))

    # 4) Larger non-128-aligned input: minimal-pad fallback + boundary mask.
    check(jax.random.normal(ks[6], (150, 131), dtype=jnp.float32),
          jax.random.normal(ks[7], (128, 160), dtype=jnp.float32))

    # 5) Big enough to use 512-row tiles and multi-chunk in-kernel accumulation.
    check(jax.random.normal(ks[8], (512, 1024), dtype=jnp.float32),
          jax.random.normal(ks[9], (512, 768), dtype=jnp.float32))

    print("KERNEL_OK")
</pallas_src>

<mosaic_0001>
module attributes {stable_mosaic.version = 11 : i64} {
  func.func @_fused_small_kernel(%arg0: i32, %arg1: memref<1x256xf32, #tpu.memory_space<vmem>>, %arg2: memref<1x256xf32, #tpu.memory_space<vmem>>, %arg3: memref<1x1xf32, #tpu.memory_space<smem>>) attributes {dimension_semantics = [#tpu.dimension_semantics<arbitrary>], iteration_bounds = array<i64: 1>, scalar_prefetch = 0 : i64, scratch_operands = 0 : i64, tpu.core_type = #tpu.core_type<tc>, window_params = [{pipeline_mode = #tpu.pipeline_mode<synchronous>, transform_indices = @transform_0, window_bounds = array<i64: 1, 256>}, {pipeline_mode = #tpu.pipeline_mode<synchronous>, transform_indices = @transform_1, window_bounds = array<i64: 1, 256>}, {transform_indices = @transform_2, window_bounds = array<i64: 1, 1>}]} {
    %c0 = arith.constant 0 : index
    %c0_0 = arith.constant 0 : index
    %0 = vector.load %arg1[%c0, %c0_0] : memref<1x256xf32, #tpu.memory_space<vmem>>, vector<1x256xf32>
    %c0_1 = arith.constant 0 : index
    %c0_2 = arith.constant 0 : index
    %1 = vector.load %arg2[%c0_1, %c0_2] : memref<1x256xf32, #tpu.memory_space<vmem>>, vector<1x256xf32>
    %cst = arith.constant 0.000000e+00 : f32
    %2 = vector.broadcast %cst : f32 to vector<1x256xf32>
    %3 = arith.subf %2, %0 : vector<1x256xf32>
    %cst_3 = arith.constant 0.000000e+00 : f32
    %4 = vector.broadcast %cst_3 : f32 to vector<1x256xf32>
    %5 = arith.maximumf %3, %4 : vector<1x256xf32>
    %6 = math.absf %3 : vector<1x256xf32>
    %cst_4 = arith.constant 0.000000e+00 : f32
    %7 = vector.broadcast %cst_4 : f32 to vector<1x256xf32>
    %8 = arith.subf %7, %6 : vector<1x256xf32>
    %9 = math.exp %8 : vector<1x256xf32>
    %10 = math.log1p %9 : vector<1x256xf32>
    %11 = arith.addf %5, %10 : vector<1x256xf32>
    %cst_5 = arith.constant 0.000000e+00 : f32
    %12 = vector.broadcast %cst_5 : f32 to vector<1x256xf32>
    %13 = arith.maximumf %1, %12 : vector<1x256xf32>
    %14 = math.absf %1 : vector<1x256xf32>
    %cst_6 = arith.constant 0.000000e+00 : f32
    %15 = vector.broadcast %cst_6 : f32 to vector<1x256xf32>
    %16 = arith.subf %15, %14 : vector<1x256xf32>
    %17 = math.exp %16 : vector<1x256xf32>
    %18 = math.log1p %17 : vector<1x256xf32>
    %19 = arith.addf %13, %18 : vector<1x256xf32>
    %20 = vector.shape_cast %11 : vector<1x256xf32> to vector<1x1x256xf32>
    %cst_7 = arith.constant dense<0.000000e+00> : vector<1xf32>
    %21 = vector.multi_reduction <add>, %20, %cst_7 [1, 2] : vector<1x1x256xf32> to vector<1xf32>
    %22 = vector.shape_cast %21 : vector<1xf32> to vector<1x1x1xf32>
    %23 = vector.extract %22[0, 0, 0] : f32 from vector<1x1x1xf32>
    %cst_8 = arith.constant 3.906250e-03 : f32
    %24 = arith.mulf %23, %cst_8 : f32
    %25 = vector.shape_cast %19 : vector<1x256xf32> to vector<1x1x256xf32>
    %cst_9 = arith.constant dense<0.000000e+00> : vector<1xf32>
    %26 = vector.multi_reduction <add>, %25, %cst_9 [1, 2] : vector<1x1x256xf32> to vector<1xf32>
    %27 = vector.shape_cast %26 : vector<1xf32> to vector<1x1x1xf32>
    %28 = vector.extract %27[0, 0, 0] : f32 from vector<1x1x1xf32>
    %cst_10 = arith.constant 3.906250e-03 : f32
    %29 = arith.mulf %28, %cst_10 : f32
    %30 = arith.addf %24, %29 : f32
    %c0_11 = arith.constant 0 : index
    %c0_12 = arith.constant 0 : index
    %31 = memref.load %arg3[%c0_11, %c0_12] : memref<1x1xf32, #tpu.memory_space<smem>>
    memref.store %30, %arg3[%c0_11, %c0_12] : memref<1x1xf32, #tpu.memory_space<smem>>
    return
  }
  func.func @transform_0(%arg0: i32) -> (i32, i32) {
    %c0_i32 = arith.constant 0 : i32
    %c0_i32_0 = arith.constant 0 : i32
    %c0_i32_1 = arith.constant 0 : i32
    return %c0_i32, %c0_i32_0 : i32, i32
  }
  func.func @transform_1(%arg0: i32) -> (i32, i32) {
    %c0_i32 = arith.constant 0 : i32
    %c0_i32_0 = arith.constant 0 : i32
    %c0_i32_1 = arith.constant 0 : i32
    return %c0_i32, %c0_i32_0 : i32, i32
  }
  func.func @transform_2(%arg0: i32) -> (i32, i32) {
    %c0_i32 = arith.constant 0 : i32
    %c0_i32_0 = arith.constant 0 : i32
    %c0_i32_1 = arith.constant 0 : i32
    return %c0_i32, %c0_i32_0 : i32, i32
  }
}

</mosaic_0001>

<bundles_post_ra>
// kernel: tpu_custom_call.1
= control target key start
LH: loop header
LB: loop body
LE: loop exit
PB: predicated region body
PF: predicated region fallthrough
CT: control target
= control target key end

     0   :  { %7 = vsyncpa [#allocation3], 0  ;;  %s217_s0 = inlined_call_operand.hbm [shape: f32[1,256], index: 0, kind: input, shape index: {}]   ;;  %s218_s1 = inlined_call_operand.vmem [shape: f32[1,256], index: 1, kind: input, shape index: {}]   ;;  %s219_s2 = inlined_call_operand.hbm [shape: f32[1,1], index: 2, kind: output, shape index: {}]  }
   0x1   :  { %8 = vsyncpa [#allocation4], 0  ;;  %s173_s9 = smov [#allocation2]   ;;  %s137_s13 = scalar_lea.hbm %s217_s0, 32 }
   0x2   :  { %s15_s10 = sshll.u32 %s173_s9, 4  ;;  %p138_p0 = scmp.ne.s32.totalorder %s217_s0, %s137_s13  ;;  %s16_s10 = int_to_ptr.vmem [resolvable:$true] %s15_s10 }
   0x3   :  { %p141_p1 = scmp.lt.u32.totalorder %s137_s13, %s217_s0 }
   0x5   :  { %p143_p2 = pnand %p141_p1, %p138_p0 }
   0x7   :  { %146 = shalt.err (!%p143_p2)
}
   0x8   :  { %s147_s18 = scalar_lea.vmem %s16_s10, 32  ;;  %p152_p4 = scmp.lt.s32.totalorder %s16_s10, %s16_s10 }
   0x9   :  { %p148_p3 = scmp.ne.s32.totalorder %s16_s10, %s147_s18  ;;  %p153_p5 = scmp.lt.s32.totalorder %s147_s18, %s147_s18 }
   0xb   :  { %p154_p6 = por %p153_p5, %p152_p4 }
   0xd   :  { %p155_p7 = pnand %p154_p6, %p148_p3 }
   0xf   :  { %158 = shalt.err (!%p155_p7)
}
  0x10   :  { %18 = dma.hbm_to_vmem [thread:$0]  %s217_s0, 32, %s16_s10, [#allocation3]  }
  0x11   :  { %169 = dma.done.wait [#allocation3], 32  }
  0x12   :  { %170 = vsyncadd [#allocation3], 4294967264  ;;  %v24_v0 = vld [vmem:[#allocation2] sm:$0x3]  ;;  %v58_v16 = vlaneseq  ;;  %vm68_vm2 = vcmask 1040384   ;;  %s159_s28 = scalar_lea.hbm %s219_s2, 16 }
  0x13   :  { %v25_v1 = vld [vmem:[%s218_s1] sm:$0x3]  ;;  %v26_v2 = vsub.f32 0.0, %v24_v0  ;;  %p160_p8 = scmp.ne.s32.totalorder %s219_s2, %s159_s28  ;;  %p163_p9 = scmp.lt.u32.totalorder %s159_s28, %s219_s2 }
  0x14   :  { %v43_v3 = vand.u32 2147483647, %v25_v1  ;;  %v59_v22 = vshrl.u32 %v58_v16, 7  ;;  %v42_v23 = vmax.f32 %v25_v1, 0.0 }
  0x15   :  { %v28_v4 = vand.u32 2147483647, %v26_v2  ;;  %v27_v27 = vmax.f32 %v26_v2, 0.0  ;;  %p165_p10 = pnand %p163_p9, %p160_p8 }
  0x16   :  { %v44_v5 = vsub.f32 0.0, %v43_v3  ;;  %v60_v30 = vsub.s32 0, %v59_v22  ;;  %v64_v31 = vsub.s32 1, %v59_v22 }
  0x17   :  { %v29_v6 = vsub.f32 0.0, %v28_v4 }
  0x18   :  { %v45_v7 = vmul.f32 1.442695, %v44_v5 }
  0x19   :  { %v30_v8 = vmul.f32 1.442695, %v29_v6 }
  0x1a   :  { %129 = vpow2.f32 %v45_v7 }
  0x1b   :  { %131 = vpow2.f32 %v30_v8 }
  0x24   :  { %v130_v9 = vpop.eup %129 }
  0x25   :  { %v47_v10 = vadd.f32 1.0, %v130_v9  ;;  %v132_v11 = vpop.eup %131  ;;  %v50_v13 = vmul.f32 -0.5, %v130_v9  ;;  %v53_v17 = vand.u32 2147483647, %v130_v9 }
  0x26   :  { %v32_v12 = vadd.f32 1.0, %v132_v11  ;;  %v35_v14 = vmul.f32 -0.5, %v132_v11  ;;  %v38_v19 = vand.u32 2147483647, %v132_v11 }
  0x27   :  { %133 = vlog2.f32 %v47_v10  ;;  %v51_v15 = vadd.f32 1.0, %v50_v13  ;;  %vm54_vm0 = vcmp.lt.f32.partialorder %v53_v17, 0.0004427343 }
  0x28   :  { %135 = vlog2.f32 %v32_v12  ;;  %v36_v18 = vadd.f32 1.0, %v35_v14  ;;  %vm39_vm1 = vcmp.lt.f32.partialorder %v38_v19, 0.0004427343 }
  0x29   :  { %v52_v20 = vmul.f32 %v130_v9, %v51_v15 }
  0x2a   :  { %v37_v24 = vmul.f32 %v132_v11, %v36_v18 }
  0x31   :  { %v134_v21 = vpop.eup %133 }
  0x32   :  { %v49_v25 = vmul.f32 0.6931472, %v134_v21  ;;  %v136_v26 = vpop.eup %135 }
  0x33   :  { %v34_v28 = vmul.f32 0.6931472, %v136_v26 }
  0x34   :  { %v55_v29 = vsel %vm54_vm0, %v52_v20, %v49_v25 }
  0x35   :  { %v56_v32 = vadd.f32 %v55_v29, %v42_v23  ;;  %v40_v33 = vsel %vm39_vm1, %v37_v24, %v34_v28 }
  0x36   :  { %v41_v34 = vadd.f32 %v40_v33, %v27_v27 }
  0x37   :  { %v86_v35 = vrot.slane %v56_v32, %v60_v30  ;;  %v90_v36 = vrot.slane %v56_v32, %v64_v31 }
  0x38   :  { %v61_v37 = vrot.slane %v41_v34, %v60_v30  ;;  %v65_v38 = vrot.slane %v41_v34, %v64_v31 }
  0x39   :  { %v93_v41 = vsel %vm68_vm2, %v86_v35, 0.0  ;;  %v94_v42 = vsel %vm68_vm2, %v90_v36, 0.0 }
  0x3a   :  { %v69_v39 = vsel %vm68_vm2, %v61_v37, 0.0  ;;  %v70_v40 = vsel %vm68_vm2, %v65_v38, 0.0  ;;  %v95_v44 = vadd.f32 %v94_v42, %v93_v41 }
  0x3b   :  { %v71_v43 = vadd.f32 %v70_v40, %v69_v39 }
  0x3d   :  { %72 = vadd.xlane.f32.xlu0 %v71_v43 }
  0x41   :  { %96 = vadd.xlane.f32.xlu0 %v95_v44 }
  0xca   :  { %v73_v45 = vpop.xlane.xlu0 %72 }
  0xcb   :  { %v74_v46 = vrot.slane %v73_v45, 4 }
  0xcd   :  { %v75_v47 = vadd.f32 %v74_v46, %v73_v45 }
  0xce   :  { %v97_v48 = vpop.xlane.xlu0 %96 }
  0xcf   :  { %v76_v49 = vrot.slane %v75_v47, 2  ;;  %v98_v50 = vrot.slane %v97_v48, 4 }
  0xd1   :  { %v99_v51 = vadd.f32 %v98_v50, %v97_v48  ;;  %v77_v52 = vadd.f32 %v76_v49, %v75_v47 }
  0xd3   :  { %v100_v53 = vrot.slane %v99_v51, 2  ;;  %v78_v54 = vrot.slane %v77_v52, 1 }
  0xd5   :  { %v101_v55 = vadd.f32 %v100_v53, %v99_v51  ;;  %v79_v56 = vadd.f32 %v78_v54, %v77_v52 }
  0xd7   :  { %123 = vpush %v79_v56  ;;  %v102_v57 = vrot.slane %v101_v55, 1 }
  0xd9   :  { %v103_v58 = vadd.f32 %v102_v57, %v101_v55 }
  0xdb   :  { %125 = vpush %v103_v58 }
 0x108   :  { %s124_s0 = spop %123 }
 0x109   :  { %s81_s1 = smul.f32 0.00390625, %s124_s0 }
 0x10c   :  { %s126_s23 = spop %125 }
 0x10d   :  { %s105_s24 = smul.f32 0.00390625, %s126_s23 }
 0x10f   :  { %s106_s25 = sadd.f32 %s105_s24, %s81_s1 }
 0x111   :  { %108 = sst [smem:[#allocation5]] %s106_s25 }
 0x112   :  { %168 = shalt.err (!%p165_p10)
}
 0x113   :  { %s174_s5 = smov [#allocation5]  }
 0x114   :  { %116 = dma.smem_to_hbm %s174_s5, 16, %s219_s2, [#allocation4]  }
 0x115   :  { %171 = dma.done.wait [#allocation4], 16  }
 0x116   :  { %172 = vsyncadd [#allocation4], 4294967280 }
 0x117   :  { %120 = sfence }
 0x118   :  { %121 = vsyncpa [#allocation3], 1 }
 0x119   :  { %122 = vsyncpa [#allocation4], 1 }

</bundles_post_ra>
